<compile_context>
chip_gen: v7x
topology: tpu7x:2x2x1
jax: 0.10.0
libtpu: 0.0.40
codegen_flags: <defaults>
</compile_context>

<pallas_src>
import math
from functools import partial

import jax
import jax.numpy as jnp
from jax.experimental import pallas as pl
from jax.experimental.pallas import tpu as pltpu

_MiB = 1024 * 1024
_VMEM_BUDGET = None


# ----------------------------------------------------------------------------
# Kernel
# ----------------------------------------------------------------------------
def _metapath_cosine_kernel(wt_ref, e1_ref, e2_ref, out_ref):
    """One batch tile of the fused (folded-chain projection + cosine) decoder.

    wt_ref:  [dK, d0]     transposed folded weight chain (VMEM-resident)
    e1_ref:  [d0, TILE_B] embeds1 tile (dim on sublanes, batch on lanes)
    e2_ref:  [dK, TILE_B] embeds2 tile
    out_ref: [1, TILE_B]  cosine similarity per batch column (lane-dense store)
    """
    # act[dK, TILE_B] = W_chain.T @ embeds1_tile  -- single MXU pass, f32 accumulate.
    act = jnp.dot(wt_ref[...], e1_ref[...], preferred_element_type=jnp.float32)
    e2 = e2_ref[...].astype(jnp.float32)

    # Cosine along the embedding (sublane) axis; batch stays on lanes.
    eps2 = jnp.float32(1e-16)  # (1e-8)**2: rsqrt(max(ss, eps^2)) == 1/max(norm, eps)
    dot = jnp.sum(act * e2, axis=0, keepdims=True)        # [1, TILE_B]
    ss1 = jnp.sum(act * act, axis=0, keepdims=True)        # [1, TILE_B]
    ss2 = jnp.sum(e2 * e2, axis=0, keepdims=True)          # [1, TILE_B]
    inv1 = jax.lax.rsqrt(jnp.maximum(ss1, eps2))            # EUP slot
    inv2 = jax.lax.rsqrt(jnp.maximum(ss2, eps2))
    out_ref[...] = (dot * inv1 * inv2).astype(out_ref.dtype)


# ----------------------------------------------------------------------------
# Tiling / VMEM budget helpers
# ----------------------------------------------------------------------------
def _round_up(x, m):
    return ((x + m - 1) // m) * m


def _round_down(x, m):
    return (x // m) * m


def _vmem_budget_bytes():
    """Generation-aware scoped-VMEM budget (~75% of physical VMEM)."""
    global _VMEM_BUDGET
    if _VMEM_BUDGET is None:
        phys = 64 * _MiB  # conservative default (v7x has the smallest VMEM)
        try:
            info = pltpu.get_tpu_info()
            phys = int(getattr(info, "vmem_capacity_bytes", phys)) or phys
        except Exception:
            pass
        _VMEM_BUDGET = (phys * 3) // 4  # ~48 MiB on v7x, ~96 MiB on v5e/v6e
    return _VMEM_BUDGET


def _per_col_bytes(d0, dK, in_itemsize):
    n_buf = 2                                    # Pallas double-buffers pipelined operands
    return (n_buf * (d0 + dK) * in_itemsize      # streamed embeds1/embeds2 tiles
            + n_buf * 4                          # output tile (f32)
            + dK * 4                             # f32 `act` intermediate
            + dK * 4                             # f32 upcast of embeds2
            + 4 * 4)                             # dot / ss / inv temporaries


def _weight_bytes(d0, dK, in_itemsize):
    return 2 * dK * d0 * in_itemsize             # resident folded weight (+slack)


def _derive_tile_b(B, d0, dK, in_itemsize, vmem_budget):
    """VMEM-budget-driven batch-tile (lane) width, not a fixed 128/256/512 ladder."""
    avail = int(vmem_budget / 1.3) - _weight_bytes(d0, dK, in_itemsize)
    t = max(avail // _per_col_bytes(d0, dK, in_itemsize), 128)
    t = min(t, _round_up(B, 128))                # never wider than the lane-padded batch
    if B >= 2 * 512:
        # Keep >= 2 grid steps so the "parallel" batch axis can be sharded across
        # both TensorCores on v7x; harmless on single-TC v5e/v6e.
        t = min(t, _round_up(-(-B // 2), 512))
    t = _round_down(t, 512) if t >= 512 else _round_down(t, 128)
    return max(t, 128)


def _batch_block_spec(block_shape, index_map, extra_buffered):
    if extra_buffered:
        try:
            return pl.BlockSpec(block_shape, index_map, pipeline_mode=pl.Buffered(3))
        except TypeError:  # older jax without pipeline_mode kwarg
            pass
    return pl.BlockSpec(block_shape, index_map)


# ----------------------------------------------------------------------------
# Launcher (jitted: fold + pallas_call in one XLA program)
# ----------------------------------------------------------------------------
@partial(jax.jit, static_argnames=("tile_b", "vmem_limit", "cast_bf16"))
def _metapath_decode_jit(embeds1, embeds2, mats, *, tile_b, vmem_limit, cast_bf16):
    d0, B = embeds1.shape
    dK = embeds2.shape[0]

    # Fold the batch-invariant metapath chain (tiny [d, d] matmuls), then
    # pre-transpose so the kernel does one [dK, d0] @ [d0, TILE_B] MXU pass.
    w = mats[0].astype(jnp.float32)
    for m in mats[1:]:
        w = jnp.dot(w, m.astype(jnp.float32), preferred_element_type=jnp.float32)

    if cast_bf16:
        # Optional: halve HBM bytes on this bandwidth-bound kernel (f32 accumulate
        # and f32 cosine epilogue are kept). Gate behind the flag; numerics differ
        # slightly from the f32 reference.
        embeds1 = embeds1.astype(jnp.bfloat16)
        embeds2 = embeds2.astype(jnp.bfloat16)
    w_t = jnp.transpose(w).astype(embeds1.dtype)           # [dK, d0]

    n_tiles = -(-B // tile_b)
    in_itemsize = jnp.dtype(embeds1.dtype).itemsize
    cost = pl.CostEstimate(
        flops=2 * dK * d0 * B + 8 * dK * B,
        transcendentals=2 * B,
        bytes_accessed=(d0 + dK) * B * in_itemsize + dK * d0 * in_itemsize + B * 4,
    )

    # With near-zero compute per step, a 3rd buffer hides DMA latency in the
    # small-tile / multi-step regime; unnecessary once tiles are MiB-scale.
    triple = (tile_b <= 512) and (n_tiles >= 3)

    out = pl.pallas_call(
        _metapath_cosine_kernel,
        out_shape=jax.ShapeDtypeStruct((1, B), jnp.float32),
        grid_spec=pltpu.PrefetchScalarGridSpec(
            num_scalar_prefetch=0,
            grid=(n_tiles,),
            in_specs=[
                # Folded weights: constant block index -> stays VMEM-resident.
                pl.BlockSpec((dK, d0), lambda i: (0, 0)),
                # Batch tiles (batch on lanes). No wrapper-side jnp.pad: the
                # ragged last block's OOB lanes only feed output lanes that the
                # masked store drops anyway.
                _batch_block_spec((d0, tile_b), lambda i: (0, i), triple),
                _batch_block_spec((dK, tile_b), lambda i: (0, i), triple),
            ],
            out_specs=pl.BlockSpec((1, tile_b), lambda i: (0, i)),
        ),
        compiler_params=pltpu.CompilerParams(
            dimension_semantics=("parallel",),
            vmem_limit_bytes=vmem_limit,
        ),
        cost_estimate=cost,
    )(w_t, embeds1, embeds2)
    return out[0]


def metapath_decode(embeds1, embeds2, mats, *, tile_b=None, cast_bf16=False):
    """embeds1: [d0, B], embeds2: [dK, B], mats: sequence of [d_i, d_{i+1}] matrices.

    Returns cosine similarity per batch column, shape [B] (float32).
    """
    d0, B = embeds1.shape
    dK = embeds2.shape[0]
    in_itemsize = 2 if cast_bf16 else jnp.dtype(embeds1.dtype).itemsize

    budget = _vmem_budget_bytes()
    if tile_b is None:
        tile_b = _derive_tile_b(B, d0, dK, in_itemsize, budget)

    est = _per_col_bytes(d0, dK, in_itemsize) * tile_b + _weight_bytes(d0, dK, in_itemsize)
    vmem_limit = int(min(budget, max(int(est * 1.4), 16 * _MiB)))

    return _metapath_decode_jit(
        embeds1, embeds2, tuple(mats),
        tile_b=int(tile_b), vmem_limit=vmem_limit, cast_bf16=bool(cast_bf16))


# ----------------------------------------------------------------------------
# Module port
# ----------------------------------------------------------------------------
class BilinearMetapathDecoder:
    """JAX/Pallas port of the PyTorch BilinearMetapathDecoder."""

    def __init__(self, relations, dims, key):
        self.relations = relations
        self.mats = {}
        idx = 0
        for r1 in relations:
            for r2 in relations[r1]:
                rel = (r1, r2[1], r2[0])
                fan_in, fan_out = dims[rel[0]], dims[rel[2]]
                # Deterministic xavier_uniform (gain=1).
                bound = math.sqrt(6.0 / (fan_in + fan_out))
                k = jax.random.fold_in(key, idx)
                idx += 1
                self.mats[rel] = jax.random.uniform(
                    k, (fan_in, fan_out), jnp.float32, minval=-bound, maxval=bound)

    def forward(self, embeds1, embeds2, rels):
        ws = tuple(self.mats[r] for r in rels)
        return metapath_decode(embeds1, embeds2, ws)

    def project(self, embeds, rel):
        # Single projection (cold path); plain JAX glue.
        return self.mats[rel] @ embeds


def _reference_forward(decoder, embeds1, embeds2, rels):
    act = embeds1.T
    for r in rels:
        act = act @ decoder.mats[r]
    act_t = act.T                                   # [dK, B]
    eps = 1e-8
    dot = jnp.sum(act_t * embeds2, axis=0)
    n1 = jnp.sqrt(jnp.sum(act_t * act_t, axis=0))
    n2 = jnp.sqrt(jnp.sum(embeds2 * embeds2, axis=0))
    return dot / (jnp.maximum(n1, eps) * jnp.maximum(n2, eps))


if __name__ == "__main__":
    key = jax.random.PRNGKey(0)

    # Small synthetic schema.
    relations = {
        "user": [("item", "buys"), ("user", "follows")],
        "item": [("user", "bought_by")],
    }
    dims = {"user": 32, "item": 16}

    decoder = BilinearMetapathDecoder(relations, dims, jax.random.fold_in(key, 100))

    # Metapath: user --buys--> item --bought_by--> user
    rels = [("user", "buys", "item"), ("item", "bought_by", "user")]

    # Test 1: tiny batch (single partial 128-wide tile, no wrapper pad).
    batch = 8
    k1, k2 = jax.random.split(key)
    embeds1 = jax.random.normal(k1, (dims["user"], batch), jnp.float32)   # [d0, B]
    embeds2 = jax.random.normal(k2, (dims["user"], batch), jnp.float32)   # [dK, B]
    out = jax.block_until_ready(decoder.forward(embeds1, embeds2, rels))
    ref = _reference_forward(decoder, embeds1, embeds2, rels)
    assert out.shape == (batch,)
    assert jnp.allclose(out, ref, atol=1e-5, rtol=1e-5)

    # Test 2: non-multiple-of-128 batch with VMEM-derived tile (single ragged block).
    batch2 = 300
    k3, k4 = jax.random.split(jax.random.fold_in(key, 7))
    e1b = jax.random.normal(k3, (dims["user"], batch2), jnp.float32)
    e2b = jax.random.normal(k4, (dims["user"], batch2), jnp.float32)
    out2 = jax.block_until_ready(decoder.forward(e1b, e2b, rels))
    ref2 = _reference_forward(decoder, e1b, e2b, rels)
    assert out2.shape == (batch2,)
    assert jnp.allclose(out2, ref2, atol=1e-5, rtol=1e-5)

    # Test 3: forced small tile -> multi-step grid with a ragged last block
    # (exercises the pipelined path / optional triple buffering).
    ws = tuple(decoder.mats[r] for r in rels)
    out3 = jax.block_until_ready(metapath_decode(e1b, e2b, ws, tile_b=128))
    assert out3.shape == (batch2,)
    assert jnp.allclose(out3, ref2, atol=1e-5, rtol=1e-5)

    print("KERNEL_OK")
</pallas_src>

<mosaic_0001>
module attributes {stable_mosaic.version = 11 : i64} {
  func.func @_metapath_cosine_kernel(%arg0: i32, %arg1: memref<32x32xf32, #tpu.memory_space<vmem>>, %arg2: memref<32x128xf32, #tpu.memory_space<vmem>>, %arg3: memref<32x128xf32, #tpu.memory_space<vmem>>, %arg4: memref<1x128xf32, #tpu.memory_space<vmem>>) attributes {dimension_semantics = [#tpu.dimension_semantics<parallel>], iteration_bounds = array<i64: 1>, scalar_prefetch = 0 : i64, scratch_operands = 0 : i64, tpu.core_type = #tpu.core_type<tc>, window_params = [{pipeline_mode = #tpu.pipeline_mode<synchronous>, transform_indices = @transform_0, window_bounds = array<i64: 32, 32>}, {transform_indices = @transform_1, window_bounds = array<i64: 32, 128>}, {transform_indices = @transform_2, window_bounds = array<i64: 32, 128>}, {transform_indices = @transform_3, window_bounds = array<i64: 1, 128>}]} {
    %c0 = arith.constant 0 : index
    %c0_0 = arith.constant 0 : index
    %0 = vector.load %arg1[%c0, %c0_0] : memref<32x32xf32, #tpu.memory_space<vmem>>, vector<32x32xf32>
    %c0_1 = arith.constant 0 : index
    %c0_2 = arith.constant 0 : index
    %1 = vector.load %arg2[%c0_1, %c0_2] : memref<32x128xf32, #tpu.memory_space<vmem>>, vector<32x128xf32>
    %cst = arith.constant dense<0.000000e+00> : vector<32x128xf32>
    %2 = tpu.matmul %0, %1, %cst {dimension_numbers = #tpu.dot_dimension_numbers<[1], [0], [0], [1], [0, 0, 1, 1], [], []>} : vector<32x32xf32>, vector<32x128xf32>, vector<32x128xf32> -> vector<32x128xf32>
    %c0_3 = arith.constant 0 : index
    %c0_4 = arith.constant 0 : index
    %3 = vector.load %arg3[%c0_3, %c0_4] : memref<32x128xf32, #tpu.memory_space<vmem>>, vector<32x128xf32>
    %4 = arith.mulf %2, %3 : vector<32x128xf32>
    %cst_5 = arith.constant dense<0.000000e+00> : vector<128xf32>
    %5 = vector.multi_reduction <add>, %4, %cst_5 [0] : vector<32x128xf32> to vector<128xf32>
    %6 = vector.shape_cast %5 : vector<128xf32> to vector<1x128xf32>
    %7 = arith.mulf %2, %2 : vector<32x128xf32>
    %cst_6 = arith.constant dense<0.000000e+00> : vector<128xf32>
    %8 = vector.multi_reduction <add>, %7, %cst_6 [0] : vector<32x128xf32> to vector<128xf32>
    %9 = vector.shape_cast %8 : vector<128xf32> to vector<1x128xf32>
    %10 = arith.mulf %3, %3 : vector<32x128xf32>
    %cst_7 = arith.constant dense<0.000000e+00> : vector<128xf32>
    %11 = vector.multi_reduction <add>, %10, %cst_7 [0] : vector<32x128xf32> to vector<128xf32>
    %12 = vector.shape_cast %11 : vector<128xf32> to vector<1x128xf32>
    %cst_8 = arith.constant 1.000000e-16 : f32
    %13 = vector.broadcast %cst_8 : f32 to vector<1x128xf32>
    %14 = arith.maximumf %9, %13 : vector<1x128xf32>
    %15 = math.rsqrt %14 : vector<1x128xf32>
    %cst_9 = arith.constant 1.000000e-16 : f32
    %16 = vector.broadcast %cst_9 : f32 to vector<1x128xf32>
    %17 = arith.maximumf %12, %16 : vector<1x128xf32>
    %18 = math.rsqrt %17 : vector<1x128xf32>
    %19 = arith.mulf %6, %15 : vector<1x128xf32>
    %20 = arith.mulf %19, %18 : vector<1x128xf32>
    %c0_10 = arith.constant 0 : index
    %c0_11 = arith.constant 0 : index
    %21 = vector.load %arg4[%c0_10, %c0_11] : memref<1x128xf32, #tpu.memory_space<vmem>>, vector<1x128xf32>
    tpu.vector_store %arg4[%c0_10, %c0_11], %20 {strides = array<i32>} : memref<1x128xf32, #tpu.memory_space<vmem>>, vector<1x128xf32>,
    return
  }
  func.func @transform_0(%arg0: i32) -> (i32, i32) {
    %c0_i32 = arith.constant 0 : i32
    %c0_i32_0 = arith.constant 0 : i32
    %c0_i32_1 = arith.constant 0 : i32
    return %c0_i32, %c0_i32_0 : i32, i32
  }
  func.func @transform_1(%arg0: i32) -> (i32, i32) {
    %c0_i32 = arith.constant 0 : i32
    %c0_i32_0 = arith.constant 0 : i32
    return %c0_i32, %arg0 : i32, i32
  }
  func.func @transform_2(%arg0: i32) -> (i32, i32) {
    %c0_i32 = arith.constant 0 : i32
    %c0_i32_0 = arith.constant 0 : i32
    return %c0_i32, %arg0 : i32, i32
  }
  func.func @transform_3(%arg0: i32) -> (i32, i32) {
    %c0_i32 = arith.constant 0 : i32
    %c0_i32_0 = arith.constant 0 : i32
    return %c0_i32, %arg0 : i32, i32
  }
}

</mosaic_0001>

<bundles_post_ra>
// kernel: _metapath_decode_jit.1
= control target key start
LH: loop header
LB: loop body
LE: loop exit
PB: predicated region body
PF: predicated region fallthrough
CT: control target
= control target key end

     0   :  { %vm23_vm0 = vcmask 261120   ;;  %s325_s0 = inlined_call_operand.vmem [shape: f32[32,32], index: 0, kind: input, shape index: {}]   ;;  %s326_s1 = inlined_call_operand.vmem [shape: f32[32,8], index: 1, kind: input, shape index: {}]   ;;  %s327_s2 = inlined_call_operand.vmem [shape: f32[32,8], index: 2, kind: input, shape index: {}]   ;;  %s328_s3 = inlined_call_operand.hbm [shape: f32[1,8], index: 3, kind: output, shape index: {}]  }
   0x1   :  { %v19_v0 = vld [vmem:[%s326_s1] sm:$0xff]  ;;  %v20_v1 = vld [vmem:[%s326_s1 + $0x8] sm:$0xff]  ;;  %v21_v2 = vld [vmem:[%s326_s1 + $0x10] sm:$0xff] }
   0x2   :  { %v211_v3 = vpack.c.bf16 %v20_v1, %v19_v0  ;;  %v22_v4 = vld [vmem:[%s326_s1 + $0x18] sm:$0xff]  ;;  %v15_v5 = vld [vmem:[%s325_s0] sm:$0xff] }
   0x3   :  { %v215_v6 = vpack.c.bf16 %v22_v4, %v21_v2  ;;  %205 = vmatprep.mubr.msk.f32.mxu0 %vm23_vm0, %v15_v5 }
   0x4   :  { %8 = vsyncpa [#allocation3], 0  ;;  %212 = vmatprep.subr.bf16.mxu0 %v211_v3  ;;  %219 = vmatprep.subr.bf16.mxu1 %v211_v3  ;;  %v17_v7 = vld [vmem:[%s325_s0 + $0x10] sm:$0xff]  ;;  %v16_v8 = vld [vmem:[%s325_s0 + $0x8] sm:$0xff] }
   0x5   :  { %214 = vmatpush3.bf16.msra.mxu0 %v211_v3  ;;  %221 = vmatpush3.bf16.msra.mxu1 %v211_v3  ;;  %v18_v9 = vld [vmem:[%s325_s0 + $0x18] sm:$0xff]  ;;  %v122_v10 = vld [vmem:[%s327_s2 + $0x8] sm:$0xff]  ;;  %v121_v11 = vld [vmem:[%s327_s2] sm:$0xff] }
   0x6   :  { %216 = vmatprep.subr.bf16.mxu0 %v215_v6  ;;  %220 = vmatprep.subr.bf16.mxu1 %v215_v6  ;;  %v152_v12 = vmul.f32 %v122_v10, %v122_v10  ;;  %v151_v13 = vmul.f32 %v121_v11, %v121_v11  ;;  %v123_v14 = vld [vmem:[%s327_s2 + $0x10] sm:$0xff]  ;;  %v124_v17 = vld [vmem:[%s327_s2 + $0x18] sm:$0xff]  ;;  %s252_s2 = smov [#allocation2]  }
   0x7   :  { %208 = vmatprep.mubr.msk.f32.mxu1 %vm23_vm0, %v17_v7  ;;  %v153_v16 = vmul.f32 %v123_v14, %v123_v14  ;;  %v154_v18 = vmul.f32 %v124_v17, %v124_v17  ;;  %s177_s7 = sshll.u32 %s252_s2, 4  ;;  %s178_s7 = int_to_ptr.vmem [resolvable:$true] %s177_s7 }
   0x8   :  { %v155_v15 = vadd.f32 %v152_v12, %v151_v13  ;;  %s228_s8 = scalar_lea.vmem %s178_s7, 16  ;;  %s232_s9 = scalar_lea.vmem %s178_s7, 32 }
   0x9   :  { %218 = vmatpush3.bf16.msra.mxu0 %v215_v6  ;;  %222 = vmatpush3.bf16.msra.mxu1 %v215_v6  ;;  %p229_p0 = scmp.ne.s32.totalorder %s178_s7, %s228_s8  ;;  %p233_p1 = scmp.lt.s32.totalorder %s178_s7, %s178_s7 }
   0xa   :  { %v156_v19 = vadd.f32 %v155_v15, %v153_v16  ;;  %p234_p2 = scmp.lt.s32.totalorder %s232_s9, %s228_s8 }
   0xc   :  { %206 = vmatmul.mubr.msk.f32.vlgmr.msra.gmra.mrb[0].mxu0 %vm23_vm0, %v16_v8  ;;  %209 = vmatmul.mubr.msk.f32.vlgmr.msra.gmra.mrb[0].mxu1 %vm23_vm0, %v18_v9  ;;  %v157_v20 = vadd.f32 %v156_v19, %v154_v18  ;;  %p235_p3 = por %p234_p2, %p233_p1 }
   0xe   :  { %v158_v21 = vrot.slane %v157_v20, 4  ;;  %p236_p4 = pnand %p235_p3, %p229_p0 }
  0x10   :  { %v159_v22 = vadd.f32 %v158_v21, %v157_v20 }
  0x12   :  { %v160_v33 = vrot.slane %v159_v22, 2 }
  0x14   :  { %v161_v40 = vadd.f32 %v160_v33, %v159_v22 }
  0x16   :  { %v162_v44 = vrot.slane %v161_v40, 1 }
  0x18   :  { %v163_v48 = vadd.f32 %v162_v44, %v161_v40 }
  0x1a   :  { %v166_v52 = vmax.f32 %v163_v48, 1e-16 }
  0x1c   :  { %224 = vrsqrt.f32 %v166_v52 }
  0x26   :  { %v225_v58 = vpop.eup %224 }
  0xdf   :  { %v207_v23 = vpop.f32.mrb[0].mxu0  ;;  %v210_v24 = vpop.f32.mrb[0].mxu1 }
  0xe0   :  { %v126_v25 = vmul.f32 %v207_v23, %v122_v10  ;;  %v139_v26 = vmul.f32 %v207_v23, %v207_v23  ;;  %v102_v27 = vpop.f32.mrb[1].mxu0  ;;  %v112_v28 = vpop.f32.mrb[1].mxu1  ;;  %v128_v36 = vmul.f32 %v210_v24, %v124_v17  ;;  %v141_v37 = vmul.f32 %v210_v24, %v210_v24 }
  0xe1   :  { %v125_v29 = vmul.f32 %v121_v11, %v102_v27  ;;  %v138_v30 = vmul.f32 %v102_v27, %v102_v27  ;;  %v127_v31 = vmul.f32 %v123_v14, %v112_v28  ;;  %v140_v32 = vmul.f32 %v112_v28, %v112_v28 }
  0xe3   :  { %v129_v34 = vadd.f32 %v126_v25, %v125_v29  ;;  %v142_v35 = vadd.f32 %v139_v26, %v138_v30 }
  0xe5   :  { %v130_v38 = vadd.f32 %v129_v34, %v127_v31  ;;  %v143_v39 = vadd.f32 %v142_v35, %v140_v32 }
  0xe7   :  { %v131_v41 = vadd.f32 %v130_v38, %v128_v36  ;;  %v144_v42 = vadd.f32 %v143_v39, %v141_v37 }
  0xe9   :  { %v145_v43 = vrot.slane %v144_v42, 4  ;;  %v132_v46 = vrot.slane %v131_v41, 4 }
  0xeb   :  { %v146_v45 = vadd.f32 %v145_v43, %v144_v42  ;;  %v133_v50 = vadd.f32 %v132_v46, %v131_v41 }
  0xed   :  { %v147_v47 = vrot.slane %v146_v45, 2  ;;  %v134_v54 = vrot.slane %v133_v50, 2 }
  0xef   :  { %v148_v49 = vadd.f32 %v147_v47, %v146_v45  ;;  %v135_v56 = vadd.f32 %v134_v54, %v133_v50 }
  0xf1   :  { %v149_v51 = vrot.slane %v148_v49, 1  ;;  %v136_v57 = vrot.slane %v135_v56, 1 }
  0xf3   :  { %v150_v53 = vadd.f32 %v149_v51, %v148_v49  ;;  %v137_v59 = vadd.f32 %v136_v57, %v135_v56 }
  0xf5   :  { %v164_v55 = vmax.f32 %v150_v53, 1e-16 }
  0xf7   :  { %226 = vrsqrt.f32 %v164_v55 }
 0x101   :  { %v227_v60 = vpop.eup %226 }
 0x102   :  { %v168_v61 = vmul.f32 %v227_v60, %v137_v59 }
 0x104   :  { %v169_v62 = vmul.f32 %v225_v58, %v168_v61 }
 0x106   :  { %170 = vst [vmem:[#allocation2] sm:$0x1] %v169_v62 }
 0x107   :  { %239 = shalt.err (!%p236_p4)
}
 0x108   :  { %s240_s12 = scalar_lea.hbm %s328_s3, 16 }
 0x109   :  { %p241_p5 = scmp.ne.s32.totalorder %s328_s3, %s240_s12  ;;  %p244_p6 = scmp.lt.u32.totalorder %s240_s12, %s328_s3 }
 0x10b   :  { %p246_p7 = pnand %p244_p6, %p241_p5 }
 0x10d   :  { %249 = shalt.err (!%p246_p7)
}
 0x10e   :  { %180 = dma.vmem_to_hbm [thread:$0]  %s178_s7, 16, %s328_s3, [#allocation3]  }
 0x10f   :  { %250 = dma.done.wait [#allocation3], 16  }
 0x110   :  { %251 = vsyncadd [#allocation3], 4294967280 }
 0x111   :  { %184 = vsyncpa [#allocation3], 1 }

</bundles_post_ra>
